<compile_context>
chip_gen: v5e
topology: v5e:2x2
jax: 0.10.0
libtpu: 0.0.40
codegen_flags: <defaults>
</compile_context>

<pallas_src>
import functools

import jax
import jax.numpy as jnp
from jax.experimental import pallas as pl
from jax.experimental.pallas import tpu as pltpu


def _round_up(a: int, b: int) -> int:
    return ((a + b - 1) // b) * b


def _largest_divisor_tile(total: int, max_tile: int, align: int) -> int:
    """Largest multiple of `align` that divides `total` and is <= max_tile."""
    best = align
    t = align
    limit = min(max_tile, total)
    while t <= limit:
        if total % t == 0:
            best = t
        t += align
    return best


def _vmem_estimate(tm: int, d: int, tdm: int) -> int:
    """Rough peak-VMEM estimate (bytes) for the chosen tiling."""
    b = 0
    b += 2 * tm * d * 2          # x tile, bf16, double-buffered
    b += 2 * tm * d * 4          # out tile, f32, double-buffered
    b += tm * d * 4              # f32 accumulator scratch
    b += 2 * 2 * d * tdm * 2     # up + gate weight slabs, bf16, double-buffered
    b += 2 * tdm * d * 2         # down weight slab, bf16, double-buffered
    b += 2 * 2 * tdm * 4         # up + gate bias slabs
    b += 2 * d * 4               # down bias
    return b


# ------------------------------ kernel ------------------------------

def _mlp_kernel(x_ref, wu_ref, bu_ref, wg_ref, bg_ref, wd_ref, bd_ref,
                o_ref, acc_ref, *, activation):
    k = pl.program_id(1)

    @pl.when(k == 0)
    def _():
        acc_ref[...] = jnp.zeros_like(acc_ref)

    x = x_ref[...]                                           # (TM, D) bf16

    # Hidden-chunk projections, f32 accumulation on the MXU.
    up = jnp.dot(x, wu_ref[...], preferred_element_type=jnp.float32) + bu_ref[...]
    gate = jnp.dot(x, wg_ref[...], preferred_element_type=jnp.float32) + bg_ref[...]

    if activation == 'relu':
        act = jnp.maximum(gate, 0.0)
    else:  # 'silu': x * sigmoid(x); single-EUP sigmoid = 0.5*(tanh(0.5*x)+1)
        act = gate * (0.5 * (jnp.tanh(0.5 * gate) + 1.0))

    h = (up * act).astype(jnp.bfloat16)                      # bf16 MXU operand
    acc_ref[...] += jnp.dot(h, wd_ref[...], preferred_element_type=jnp.float32)

    @pl.when(k == pl.num_programs(1) - 1)
    def _():
        o_ref[...] = (acc_ref[...] + bd_ref[...]).astype(o_ref.dtype)


# ------------------------------ wrapper ------------------------------

def prepare_params(up_w, up_b, gate_w, gate_b, down_w, down_b):
    """Host-side (one-time) weight preprocessing.

    PyTorch Linear stores W as (out_features, in_features) and computes
    y = x @ W.T + b; pre-transpose so the kernel does plain jnp.dot(x, W)
    with lane-dense bf16 weight operands (no .T inside the kernel).
    """
    return dict(
        wu=up_w.T.astype(jnp.bfloat16),          # (D, Dm)
        bu=up_b[None, :].astype(jnp.float32),    # (1, Dm)
        wg=gate_w.T.astype(jnp.bfloat16),        # (D, Dm)
        bg=gate_b[None, :].astype(jnp.float32),  # (1, Dm)
        wd=down_w.T.astype(jnp.bfloat16),        # (Dm, D)
        bd=down_b[None, :].astype(jnp.float32),  # (1, D)
    )


def mlp_forward(x, params, cfg, *, max_row_tile=512, max_hidden_tile=512):
    """x: (batch, position, d_model) -> (batch, position, d_model) f32."""
    B, S, D = x.shape
    Dm = cfg['d_mlp']
    N = B * S

    # Stream x as bf16 (halves input DMA bytes); accumulate/activate in f32.
    xf = x.reshape(N, D).astype(jnp.bfloat16)

    # ---- per-generation VMEM budget ----
    try:
        info = pltpu.get_tpu_info()
        vmem_cap = getattr(info, 'vmem_capacity_bytes', None) or (64 * 1024 * 1024)
    except Exception:
        vmem_cap = 64 * 1024 * 1024            # conservative (v7x per-TC)
    vmem_budget = int(vmem_cap * 0.85)

    # Shrink tile caps until the rough estimate fits the budget.
    cap_tm, cap_tdm = max_row_tile, max_hidden_tile
    while _vmem_estimate(cap_tm, D, cap_tdm) > vmem_budget:
        if cap_tdm > 128:
            cap_tdm //= 2
        elif cap_tm > 8:
            cap_tm //= 2
        else:
            break

    # ---- row tile: largest sublane-aligned divisor (minimizes padding) ----
    N_pad = _round_up(N, 8)
    TM = _largest_divisor_tile(N_pad, cap_tm, 8)

    # ---- hidden (d_mlp) tile: lane-aligned; full dim if it fits the cap ----
    if Dm <= cap_tdm:
        Dm_pad, TDm = Dm, Dm
    else:
        Dm_pad = _round_up(Dm, 128)
        TDm = _largest_divisor_tile(Dm_pad, cap_tdm, 128)

    # ---- pad inputs / params (zero padding is exact for this MLP) ----
    if N_pad != N:
        xf = jnp.pad(xf, ((0, N_pad - N), (0, 0)))

    wu, bu = params['wu'], params['bu']
    wg, bg = params['wg'], params['bg']
    wd, bd = params['wd'], params['bd']
    if Dm_pad != Dm:
        pc = ((0, 0), (0, Dm_pad - Dm))
        wu = jnp.pad(wu, pc)
        wg = jnp.pad(wg, pc)
        bu = jnp.pad(bu, pc)
        bg = jnp.pad(bg, pc)
        wd = jnp.pad(wd, ((0, Dm_pad - Dm), (0, 0)))

    kernel = functools.partial(_mlp_kernel, activation=cfg['activation'])

    flops = 6 * N_pad * D * Dm_pad
    transcendentals = N_pad * Dm_pad if cfg['activation'] == 'silu' else 0
    bytes_accessed = (xf.size * 2 + N_pad * D * 4
                      + (wu.size + wg.size + wd.size) * 2
                      + (bu.size + bg.size + bd.size) * 4)

    out = pl.pallas_call(
        kernel,
        out_shape=jax.ShapeDtypeStruct((N_pad, D), jnp.float32),
        grid=(N_pad // TM, Dm_pad // TDm),
        in_specs=[
            pl.BlockSpec((TM, D), lambda i, k: (i, 0)),    # x tile (bf16, constant over k)
            pl.BlockSpec((D, TDm), lambda i, k: (0, k)),   # up weight slab (streams over k)
            pl.BlockSpec((1, TDm), lambda i, k: (0, k)),   # up bias slab
            pl.BlockSpec((D, TDm), lambda i, k: (0, k)),   # gate weight slab
            pl.BlockSpec((1, TDm), lambda i, k: (0, k)),   # gate bias slab
            pl.BlockSpec((TDm, D), lambda i, k: (k, 0)),   # down weight slab
            pl.BlockSpec((1, D), lambda i, k: (0, 0)),     # down bias (resident)
        ],
        out_specs=pl.BlockSpec((TM, D), lambda i, k: (i, 0)),
        scratch_shapes=[pltpu.VMEM((TM, D), jnp.float32)],
        compiler_params=pltpu.CompilerParams(
            # Row axis parallel (megacore/TC sharding where supported),
            # hidden/reduction axis last and arbitrary.
            dimension_semantics=("parallel", "arbitrary"),
            vmem_limit_bytes=vmem_budget,
        ),
        cost_estimate=pl.CostEstimate(
            flops=flops,
            transcendentals=transcendentals,
            bytes_accessed=bytes_accessed,
        ),
    )(xf, wu, bu, wg, bg, wd, bd)

    return out[:N].reshape(B, S, D)


# ------------------------------ reference & init ------------------------------

def mlp_reference(x2d, up_w, up_b, gate_w, gate_b, down_w, down_b, activation):
    up = x2d @ up_w.T + up_b
    gate = x2d @ gate_w.T + gate_b
    act = jnp.maximum(gate, 0.0) if activation == 'relu' else gate * jax.nn.sigmoid(gate)
    return (up * act) @ down_w.T + down_b


def trunc_normal(key, shape, std=0.02, cutoff=0.09):
    a = cutoff / std
    return std * jax.random.truncated_normal(key, -a, a, shape, jnp.float32)


if __name__ == "__main__":
    cfg = dict(d_model=32, d_mlp=64, activation='silu')
    D, Dm = cfg['d_model'], cfg['d_mlp']

    key = jax.random.PRNGKey(0)
    k_w, k_x = jax.random.split(key)
    ks = jax.random.split(k_w, 3)

    # Weights follow the PyTorch Linear (out_features, in_features) convention.
    up_w = trunc_normal(ks[0], (Dm, D))
    gate_w = trunc_normal(ks[1], (Dm, D))
    down_w = trunc_normal(ks[2], (D, Dm))
    up_b = jnp.zeros((Dm,), jnp.float32)
    gate_b = jnp.zeros((Dm,), jnp.float32)
    down_b = jnp.zeros((D,), jnp.float32)

    batch, seq = 2, 8
    x = jax.random.normal(k_x, (batch, seq, D), jnp.float32)

    params = prepare_params(up_w, up_b, gate_w, gate_b, down_w, down_b)
    out = mlp_forward(x, params, cfg)
    out = jax.block_until_ready(out)

    assert out.shape == (batch, seq, D)
    assert bool(jnp.all(jnp.isfinite(out)))

    ref = mlp_reference(x.reshape(-1, D), up_w, up_b, gate_w, gate_b,
                        down_w, down_b, cfg['activation'])
    err = float(jnp.max(jnp.abs(out.reshape(-1, D) - ref)))
    scale = float(jnp.max(jnp.abs(ref)))
    assert err <= 5e-3 + 5e-2 * scale, (err, scale)   # bf16 operands -> loose tolerance

    print("KERNEL_OK")
</pallas_src>

<mosaic_0001>
module attributes {stable_mosaic.version = 11 : i64} {
  func.func @_mlp_kernel(%arg0: i32, %arg1: i32, %arg2: memref<16x32xbf16, #tpu.memory_space<vmem>>, %arg3: memref<32x64xbf16, #tpu.memory_space<vmem>>, %arg4: memref<1x64xf32, #tpu.memory_space<vmem>>, %arg5: memref<32x64xbf16, #tpu.memory_space<vmem>>, %arg6: memref<1x64xf32, #tpu.memory_space<vmem>>, %arg7: memref<64x32xbf16, #tpu.memory_space<vmem>>, %arg8: memref<1x32xf32, #tpu.memory_space<vmem>>, %arg9: memref<16x32xf32, #tpu.memory_space<vmem>>, %arg10: memref<16x32xf32, #tpu.memory_space<vmem>>) attributes {dimension_semantics = [#tpu.dimension_semantics<parallel>, #tpu.dimension_semantics<arbitrary>], iteration_bounds = array<i64: 1, 1>, scalar_prefetch = 0 : i64, scratch_operands = 1 : i64, tpu.core_type = #tpu.core_type<tc>, window_params = [{transform_indices = @transform_0, window_bounds = array<i64: 16, 32>}, {transform_indices = @transform_1, window_bounds = array<i64: 32, 64>}, {transform_indices = @transform_2, window_bounds = array<i64: 1, 64>}, {transform_indices = @transform_3, window_bounds = array<i64: 32, 64>}, {transform_indices = @transform_4, window_bounds = array<i64: 1, 64>}, {transform_indices = @transform_5, window_bounds = array<i64: 64, 32>}, {pipeline_mode = #tpu.pipeline_mode<synchronous>, transform_indices = @transform_6, window_bounds = array<i64: 1, 32>}, {transform_indices = @transform_7, window_bounds = array<i64: 16, 32>}]} {
    %c0_i32 = arith.constant 0 : i32
    %0 = arith.cmpi eq, %arg1, %c0_i32 : i32
    %1 = arith.extui %0 : i1 to i32
    %c0_i32_0 = arith.constant 0 : i32
    %2 = arith.cmpi ne, %1, %c0_i32_0 : i32
    scf.if %2 {
      %cst_23 = arith.constant 0.000000e+00 : f32
      %32 = vector.broadcast %cst_23 : f32 to vector<16x32xf32>
      %c0_24 = arith.constant 0 : index
      %c0_25 = arith.constant 0 : index
      %33 = vector.load %arg10[%c0_24, %c0_25] : memref<16x32xf32, #tpu.memory_space<vmem>>, vector<16x32xf32>
      tpu.vector_store %arg10[%c0_24, %c0_25], %32 {strides = array<i32>} : memref<16x32xf32, #tpu.memory_space<vmem>>, vector<16x32xf32>,
    } else {
    }
    %c0 = arith.constant 0 : index
    %c0_1 = arith.constant 0 : index
    %3 = vector.load %arg2[%c0, %c0_1] : memref<16x32xbf16, #tpu.memory_space<vmem>>, vector<16x32xbf16>
    %c0_2 = arith.constant 0 : index
    %c0_3 = arith.constant 0 : index
    %4 = vector.load %arg3[%c0_2, %c0_3] : memref<32x64xbf16, #tpu.memory_space<vmem>>, vector<32x64xbf16>
    %cst = arith.constant dense<0.000000e+00> : vector<16x64xf32>
    %5 = tpu.matmul %3, %4, %cst {dimension_numbers = #tpu.dot_dimension_numbers<[1], [0], [0], [1], [0, 0, 1, 1], [], []>} : vector<16x32xbf16>, vector<32x64xbf16>, vector<16x64xf32> -> vector<16x64xf32>
    %c0_4 = arith.constant 0 : index
    %c0_5 = arith.constant 0 : index
    %6 = vector.load %arg4[%c0_4, %c0_5] : memref<1x64xf32, #tpu.memory_space<vmem>>, vector<1x64xf32>
    %7 = vector.broadcast %6 : vector<1x64xf32> to vector<16x64xf32>
    %8 = arith.addf %5, %7 : vector<16x64xf32>
    %c0_6 = arith.constant 0 : index
    %c0_7 = arith.constant 0 : index
    %9 = vector.load %arg5[%c0_6, %c0_7] : memref<32x64xbf16, #tpu.memory_space<vmem>>, vector<32x64xbf16>
    %cst_8 = arith.constant dense<0.000000e+00> : vector<16x64xf32>
    %10 = tpu.matmul %3, %9, %cst_8 {dimension_numbers = #tpu.dot_dimension_numbers<[1], [0], [0], [1], [0, 0, 1, 1], [], []>} : vector<16x32xbf16>, vector<32x64xbf16>, vector<16x64xf32> -> vector<16x64xf32>
    %c0_9 = arith.constant 0 : index
    %c0_10 = arith.constant 0 : index
    %11 = vector.load %arg6[%c0_9, %c0_10] : memref<1x64xf32, #tpu.memory_space<vmem>>, vector<1x64xf32>
    %12 = vector.broadcast %11 : vector<1x64xf32> to vector<16x64xf32>
    %13 = arith.addf %10, %12 : vector<16x64xf32>
    %cst_11 = arith.constant 5.000000e-01 : f32
    %14 = vector.broadcast %cst_11 : f32 to vector<16x64xf32>
    %15 = arith.mulf %14, %13 : vector<16x64xf32>
    %16 = math.tanh %15 : vector<16x64xf32>
    %cst_12 = arith.constant 1.000000e+00 : f32
    %17 = vector.broadcast %cst_12 : f32 to vector<16x64xf32>
    %18 = arith.addf %16, %17 : vector<16x64xf32>
    %cst_13 = arith.constant 5.000000e-01 : f32
    %19 = vector.broadcast %cst_13 : f32 to vector<16x64xf32>
    %20 = arith.mulf %19, %18 : vector<16x64xf32>
    %21 = arith.mulf %13, %20 : vector<16x64xf32>
    %22 = arith.mulf %8, %21 : vector<16x64xf32>
    %23 = arith.truncf %22 : vector<16x64xf32> to vector<16x64xbf16>
    %c0_14 = arith.constant 0 : index
    %c0_15 = arith.constant 0 : index
    %24 = vector.load %arg10[%c0_14, %c0_15] : memref<16x32xf32, #tpu.memory_space<vmem>>, vector<16x32xf32>
    %c0_16 = arith.constant 0 : index
    %c0_17 = arith.constant 0 : index
    %25 = vector.load %arg7[%c0_16, %c0_17] : memref<64x32xbf16, #tpu.memory_space<vmem>>, vector<64x32xbf16>
    %cst_18 = arith.constant dense<0.000000e+00> : vector<16x32xf32>
    %26 = tpu.matmul %23, %25, %cst_18 {dimension_numbers = #tpu.dot_dimension_numbers<[1], [0], [0], [1], [0, 0, 1, 1], [], []>} : vector<16x64xbf16>, vector<64x32xbf16>, vector<16x32xf32> -> vector<16x32xf32>
    %27 = arith.addf %24, %26 : vector<16x32xf32>
    %c0_19 = arith.constant 0 : index
    %c0_20 = arith.constant 0 : index
    %28 = vector.load %arg10[%c0_19, %c0_20] : memref<16x32xf32, #tpu.memory_space<vmem>>, vector<16x32xf32>
    tpu.vector_store %arg10[%c0_19, %c0_20], %27 {strides = array<i32>} : memref<16x32xf32, #tpu.memory_space<vmem>>, vector<16x32xf32>,
    %c0_i32_21 = arith.constant 0 : i32
    %29 = arith.cmpi eq, %arg1, %c0_i32_21 : i32
    %30 = arith.extui %29 : i1 to i32
    %c0_i32_22 = arith.constant 0 : i32
    %31 = arith.cmpi ne, %30, %c0_i32_22 : i32
    scf.if %31 {
      %c0_23 = arith.constant 0 : index
      %c0_24 = arith.constant 0 : index
      %32 = vector.load %arg10[%c0_23, %c0_24] : memref<16x32xf32, #tpu.memory_space<vmem>>, vector<16x32xf32>
      %c0_25 = arith.constant 0 : index
      %c0_26 = arith.constant 0 : index
      %33 = vector.load %arg8[%c0_25, %c0_26] : memref<1x32xf32, #tpu.memory_space<vmem>>, vector<1x32xf32>
      %34 = vector.broadcast %33 : vector<1x32xf32> to vector<16x32xf32>
      %35 = arith.addf %32, %34 : vector<16x32xf32>
      %c0_27 = arith.constant 0 : index
      %c0_28 = arith.constant 0 : index
      %36 = vector.load %arg9[%c0_27, %c0_28] : memref<16x32xf32, #tpu.memory_space<vmem>>, vector<16x32xf32>
      tpu.vector_store %arg9[%c0_27, %c0_28], %35 {strides = array<i32>} : memref<16x32xf32, #tpu.memory_space<vmem>>, vector<16x32xf32>,
    } else {
    }
    return
  }
  func.func @transform_0(%arg0: i32, %arg1: i32) -> (i32, i32) {
    %c0_i32 = arith.constant 0 : i32
    %c0_i32_0 = arith.constant 0 : i32
    return %arg0, %c0_i32 : i32, i32
  }
  func.func @transform_1(%arg0: i32, %arg1: i32) -> (i32, i32) {
    %c0_i32 = arith.constant 0 : i32
    %c0_i32_0 = arith.constant 0 : i32
    return %c0_i32, %arg1 : i32, i32
  }
  func.func @transform_2(%arg0: i32, %arg1: i32) -> (i32, i32) {
    %c0_i32 = arith.constant 0 : i32
    %c0_i32_0 = arith.constant 0 : i32
    return %c0_i32, %arg1 : i32, i32
  }
  func.func @transform_3(%arg0: i32, %arg1: i32) -> (i32, i32) {
    %c0_i32 = arith.constant 0 : i32
    %c0_i32_0 = arith.constant 0 : i32
    return %c0_i32, %arg1 : i32, i32
  }
  func.func @transform_4(%arg0: i32, %arg1: i32) -> (i32, i32) {
    %c0_i32 = arith.constant 0 : i32
    %c0_i32_0 = arith.constant 0 : i32
    return %c0_i32, %arg1 : i32, i32
  }
  func.func @transform_5(%arg0: i32, %arg1: i32) -> (i32, i32) {
    %c0_i32 = arith.constant 0 : i32
    %c0_i32_0 = arith.constant 0 : i32
    return %arg1, %c0_i32 : i32, i32
  }
  func.func @transform_6(%arg0: i32, %arg1: i32) -> (i32, i32) {
    %c0_i32 = arith.constant 0 : i32
    %c0_i32_0 = arith.constant 0 : i32
    %c0_i32_1 = arith.constant 0 : i32
    return %c0_i32, %c0_i32_0 : i32, i32
  }
  func.func @transform_7(%arg0: i32, %arg1: i32) -> (i32, i32) {
    %c0_i32 = arith.constant 0 : i32
    %c0_i32_0 = arith.constant 0 : i32
    return %arg0, %c0_i32 : i32, i32
  }
}

</mosaic_0001>

<bundles_post_ra>
// kernel: tpu_custom_call.1
= control target key start
LH: loop header
LB: loop body
LE: loop exit
PB: predicated region body
PF: predicated region fallthrough
CT: control target
= control target key end

     0   :  { %s390_s0 = inlined_call_operand.vmem [shape: bf16[16,32], index: 0, kind: input, shape index: {}]   ;;  %s391_s1 = inlined_call_operand.vmem [shape: bf16[32,64], index: 1, kind: input, shape index: {}]   ;;  %s392_s2 = inlined_call_operand.vmem [shape: f32[1,64], index: 2, kind: input, shape index: {}]   ;;  %s393_s3 = inlined_call_operand.vmem [shape: bf16[32,64], index: 3, kind: input, shape index: {}]   ;;  %s394_s4 = inlined_call_operand.vmem [shape: f32[1,64], index: 4, kind: input, shape index: {}]   ;;  %s395_s5 = inlined_call_operand.vmem [shape: bf16[64,32], index: 5, kind: input, shape index: {}]   ;;  %s396_s6 = inlined_call_operand.vmem [shape: f32[1,32], index: 6, kind: input, shape index: {}]   ;;  %s397_s7 = inlined_call_operand.hbm [shape: f32[16,32], index: 7, kind: output, shape index: {}]  }
   0x1   :  { %v257_v0 = vld [vmem:[%s393_s3 + $0x8] sm:$0xff]  ;;  %v256_v2 = vld [vmem:[%s393_s3] sm:$0xff] }
   0x2   :  { %v255_v1 = vld [vmem:[%s391_s1 + $0x8] sm:$0xff]  ;;  %106 = vmatpush.bf16.msra.mxu1 %v257_v0  ;;  %v254_v3 = vld [vmem:[%s391_s1] sm:$0xff] }
   0x3   :  { %72 = vmatpush.bf16.msra.mxu0 %v255_v1 }
   0x4   :  { %12 = vsyncpa [#allocation4], 0  ;;  %v253_v4 = vld [vmem:[%s390_s0] sm:$0xff]  ;;  %vm32_vm0 = vcmask 261120   ;;  %v261_v5 = vld [vmem:[%s395_s5 + $0x18] sm:$0xff]  ;;  %v299_v10 = vmov 0.0  }
   0x5   :  { %169 = vmatpush.bf16.msra.mxu2 %v261_v5  ;;  %v260_v6 = vld [vmem:[%s395_s5 + $0x10] sm:$0xff]  ;;  %v259_v7 = vld [vmem:[%s395_s5 + $0x8] sm:$0xff]  ;;  %v258_v8 = vld [vmem:[%s395_s5] sm:$0xff]  ;;  %33 = vst.msk [vmem:[#allocation2] sm:$0xff] %vm32_vm0, %v299_v10  ;;  %vm161_vm1 = vcmask 523264   ;;  %s300_s19 = smov [#allocation3]  }
   0x6   :  { %107 = vmatpush.bf16.msra.mxu1 %v256_v2  ;;  %v266_v9 = vld [vmem:[%s394_s4] ss:$0 sm:$0xff]  ;;  %34 = vst.msk [vmem:[#allocation2 + $0x8] sm:$0xff] %vm32_vm0, %v299_v10  ;;  %s200_s20 = sshll.u32 %s300_s19, 4  ;;  %s202_s23 = sshll.u32 %s397_s7, 4  ;;  %s201_s20 = int_to_ptr.vmem [resolvable:$true] %s200_s20  ;;  %s203_s23 = int_to_ptr.hbm [resolvable:$true] %s202_s23 }
   0x7   :  { %73 = vmatpush.bf16.msra.mxu0 %v254_v3  ;;  %v267_v21 = vld [vmem:[%s392_s2] ss:$0 sm:$0xff]  ;;  %s302_s24 = smov 8  }
   0x8   :  { %v268_v37 = vld [vmem:[%s396_s6] ss:$0 sm:$0xff]  ;;  %s301_s6 = smov 128  }
   0x9   :  { %235 = vmatmul.msk.bf16.vlgmr.msra.gmra.mxu1 %vm32_vm0, %v253_v4  ;;  %170 = vmatpush.bf16.msra.mxu2 %v260_v6 }
   0xa   :  { %226 = vmatmul.msk.bf16.vlgmr.msra.gmra.mxu0 %vm32_vm0, %v253_v4 }
   0xc   :  { %v127_v33 = vld [vmem:[#allocation2] sm:$0xff] }
   0xd   :  { %171 = vmatpush.bf16.msra.mxu2 %v259_v7  ;;  %v128_v36 = vld [vmem:[#allocation2 + $0x8] sm:$0xff] }
  0x11   :  { %172 = vmatpush.bf16.msra.mxu2 %v258_v8 }
  0x86   :  { %v109_v11 = vpop.f32.mrf.mxu1 }
  0x87   :  { %v110_v12 = vadd.f32 %v266_v9, %v109_v11  ;;  %v75_v17 = vpop.f32.mrf.mxu0 }
  0x88   :  { %v76_v26 = vadd.f32 %v267_v21, %v75_v17 }
  0x89   :  { %v114_v13 = vmul.f32 0.5, %v110_v12 }
  0x8b   :  { %269 = vtanh.f32 %v114_v13 }
  0x8e   :  { %v111_v14 = vpop.f32.mrf.mxu1 }
  0x8f   :  { %v112_v15 = vadd.f32 %v266_v9, %v111_v14  ;;  %v77_v24 = vpop.f32.mrf.mxu0 }
  0x90   :  { %v78_v29 = vadd.f32 %v267_v21, %v77_v24 }
  0x91   :  { %v270_v16 = vpop.eup %269  ;;  %v115_v18 = vmul.f32 0.5, %v112_v15 }
  0x92   :  { %v118_v19 = vadd.f32 1.0, %v270_v16 }
  0x93   :  { %271 = vtanh.f32 %v115_v18 }
  0x94   :  { %v120_v20 = vmul.f32 0.5, %v118_v19 }
  0x96   :  { %v122_v25 = vmul.f32 %v120_v20, %v110_v12 }
  0x98   :  { %v124_v30 = vmul.f32 %v122_v25, %v76_v26 }
  0x99   :  { %v272_v22 = vpop.eup %271 }
  0x9a   :  { %v119_v23 = vadd.f32 1.0, %v272_v22 }
  0x9c   :  { %v121_v27 = vmul.f32 0.5, %v119_v23 }
  0x9e   :  { %v123_v28 = vmul.f32 %v121_v27, %v112_v15 }
  0xa0   :  { %v125_v31 = vmul.f32 %v123_v28, %v78_v29 }
  0xa2   :  { %v126_v32 = vpack.c.bf16 %v125_v31, %v124_v30 }
  0xa4   :  { %252 = vmatmul.msk.bf16.vlgmr.msra.gmra.mxu2 %vm161_vm1, %v126_v32 }
 0x127   :  { %v174_v34 = vpop.f32.mrf.mxu2 }
 0x128   :  { %v179_v35 = vadd.f32 %v174_v34, %v127_v33 }
 0x12a   :  { %181 = vst.msk [vmem:[#allocation2] sm:$0xff] %vm32_vm0, %v179_v35 }
 0x12f   :  { %v176_v38 = vpop.f32.mrf.mxu2 }
 0x130   :  { %v180_v39 = vadd.f32 %v176_v38, %v128_v36 }
 0x131   :  { %v186_v40 = vld [vmem:[#allocation2] sm:$0xff] }
 0x132   :  { %182 = vst.msk [vmem:[#allocation2 + $0x8] sm:$0xff] %vm32_vm0, %v180_v39  ;;  %v192_v41 = vadd.f32 %v268_v37, %v186_v40 }
 0x134   :  { %194 = vst.msk [vmem:[#allocation3] sm:$0xff] %vm32_vm0, %v192_v41 }
 0x139   :  { %v187_v42 = vld [vmem:[#allocation2 + $0x8] sm:$0xff] }
 0x13a   :  { %v193_v43 = vadd.f32 %v268_v37, %v187_v42 }
 0x13c   :  { %195 = vst.msk [vmem:[#allocation3 + $0x8] sm:$0xff] %vm32_vm0, %v193_v43 }
 0x13d   :  { %208 = dma.vmem_to_hbm [thread:$0]  %s201_s20, 256, %s203_s23, [#allocation4], %s301_s6, %s301_s6, %s302_s24  }
 0x13e   :  { %297 = dma.done.wait [#allocation4], 256  }
 0x13f   :  { %298 = vsyncadd [#allocation4], 4294967040 }
 0x140   :  { %213 = vsyncpa [#allocation4], 1 }

</bundles_post_ra>
